<compile_context>
chip_gen: v7x
topology: tpu7x:2x2x1
jax: 0.10.0
libtpu: 0.0.40
codegen_flags: <defaults>
</compile_context>

<pallas_src>
import jax
import jax.numpy as jnp
from jax.experimental import pallas as pl
from jax.experimental.pallas import tpu as pltpu

# ----- model hyper-parameters (small, consistent with the module) -----
VOCAB_SIZE = 32
EMBEDDING_DIM = 8
CONTEXT_SIZE = 8
HIDDEN_DIM = 32
OUTPUT_DIM = 16
BATCH = 4

# ----- fused / packed layout constants -----
LANE = 128                                   # lane-pad the params slab + output
FUSED_K = CONTEXT_SIZE * VOCAB_SIZE          # 256: flattened (context, vocab) axis
W2_ROW0 = FUSED_K                            # rows [256, 288): fc2 weight (HIDDEN, LANE)
B1_ROW = FUSED_K + HIDDEN_DIM                # row 288: fc1 bias in cols [0, HIDDEN)
B2_ROW = B1_ROW + 1                          # row 289: fc2 bias (lane-padded)
SLAB_ROWS = ((B2_ROW + 1 + 7) // 8) * 8      # 296: pad row count to a multiple of 8

TILE_B_CAP = 512  # largest batch tile (multiple of 8); ~1 MiB of activations per tile


def fused_ffnn_kernel(ids_ref, slab_ref, o_ref):
    """Fused embedding-gather + flatten + fc1 + ReLU + fc2 for one batch tile.

    ids_ref : (tile_b, CONTEXT_SIZE) int32 token ids
    slab_ref: (SLAB_ROWS, LANE) f32 packed params:
                rows [0,256)   cols [0,32)  -> fused_w1 = embedding @ fc1 (per context slot)
                rows [256,288) cols [0,128) -> fc2 weight (cols >= OUTPUT_DIM are zero)
                row  288       cols [0,32)  -> fc1 bias
                row  289       cols [0,128) -> fc2 bias (cols >= OUTPUT_DIM are zero)
    o_ref   : (tile_b, LANE) f32, cols >= OUTPUT_DIM are zero (sliced off by the wrapper)
    """
    ids = ids_ref[...]                                   # (tile_b, ctx) int32
    tile_b = ids.shape[0]

    # Flat one-hot over the (context*vocab) axis: onehot[b, c*V + v] = (ids[b, c] == v).
    # Built with 8 widened compares OR-ed together (bands are disjoint); avoids gather,
    # repeat, reshape and concat for robust lowering. 8 VPU compares are noise here.
    flat_iota = jax.lax.broadcasted_iota(jnp.int32, (tile_b, FUSED_K), 1)
    hit = flat_iota == ids[:, 0:1]                       # context slot 0 (offset 0)
    for c in range(1, CONTEXT_SIZE):                     # static unroll, small fixed count
        hit = jnp.logical_or(hit, flat_iota == (ids[:, c:c + 1] + c * VOCAB_SIZE))
    onehot = hit.astype(jnp.float32)                     # (tile_b, 256)

    # Static views into the packed params slab (single resident operand).
    fused_w1 = slab_ref[0:FUSED_K, 0:HIDDEN_DIM]                  # (256, 32)
    b1 = slab_ref[B1_ROW:B1_ROW + 1, 0:HIDDEN_DIM]                # (1, 32)
    w2 = slab_ref[W2_ROW0:W2_ROW0 + HIDDEN_DIM, :]                # (32, 128)
    b2 = slab_ref[B2_ROW:B2_ROW + 1, :]                           # (1, 128)

    # One K=256 MXU matmul does embedding gather + flatten + fc1 in one shot.
    h = jnp.dot(onehot, fused_w1, preferred_element_type=jnp.float32)   # (tile_b, 32)
    h = jnp.maximum(h + b1, 0.0)                                        # bias + ReLU (VPU, f32)
    out = jnp.dot(h, w2, preferred_element_type=jnp.float32) + b2       # (tile_b, 128)
    o_ref[...] = out.astype(o_ref.dtype)                                # lane-dense store


def prepare_params(params):
    """One-time conversion from PyTorch nn.Module layout into a single packed slab.

    Folds the embedding table into fc1 (fused_w1 = embedding @ fc1_split[c]) so the
    kernel needs no embedding operand and no in-kernel gather/reshape, and packs every
    remaining parameter into one lane-padded f32 slab.
    """
    emb = params["embedding"].astype(jnp.float32)                       # (V, E)
    w1_split = params["fc1_w"].astype(jnp.float32).T.reshape(
        CONTEXT_SIZE, EMBEDDING_DIM, HIDDEN_DIM)                        # (c, e, h)
    # fused_w1[c*V + v, h] = sum_e emb[v, e] * w1_split[c, e, h]
    fused_w1 = jnp.einsum("ve,ceh->cvh", emb, w1_split,
                          precision=jax.lax.Precision.HIGHEST
                          ).reshape(FUSED_K, HIDDEN_DIM)                # (256, 32)
    w2_t = params["fc2_w"].astype(jnp.float32).T                        # (H, O)
    b1 = params["fc1_b"].astype(jnp.float32)
    b2 = params["fc2_b"].astype(jnp.float32)

    slab = jnp.zeros((SLAB_ROWS, LANE), jnp.float32)
    slab = slab.at[0:FUSED_K, 0:HIDDEN_DIM].set(fused_w1)
    slab = slab.at[W2_ROW0:W2_ROW0 + HIDDEN_DIM, 0:OUTPUT_DIM].set(w2_t)
    slab = slab.at[B1_ROW, 0:HIDDEN_DIM].set(b1)
    slab = slab.at[B2_ROW, 0:OUTPUT_DIM].set(b2)
    return slab


@jax.jit
def simple_ffnn_forward(context_words, param_slab):
    """Full forward pass as a single fused Pallas kernel call."""
    B = context_words.shape[0]
    ids = context_words.astype(jnp.int32)

    if B <= TILE_B_CAP:
        # Whole batch in one tile (block_shape == full array dims, so no (8,128) issue).
        # At toy sizes a single grid step is the right call; v7x 2-TC sharding only kicks
        # in once the batch spans >= 2 tiles below.
        tile_b, padded_b = B, B
    else:
        tile_b = TILE_B_CAP
        padded_b = pl.cdiv(B, tile_b) * tile_b
        ids = jnp.pad(ids, ((0, padded_b - B), (0, 0)))   # pad rows sliced off below

    out = pl.pallas_call(
        fused_ffnn_kernel,
        out_shape=jax.ShapeDtypeStruct((padded_b, LANE), jnp.float32),
        grid=(padded_b // tile_b,),
        in_specs=[
            pl.BlockSpec((tile_b, CONTEXT_SIZE), lambda i: (i, 0)),   # ids: batch-tiled
            pl.BlockSpec((SLAB_ROWS, LANE), lambda i: (0, 0)),        # params slab: resident
        ],
        out_specs=pl.BlockSpec((tile_b, LANE), lambda i: (i, 0)),
        compiler_params=pltpu.CompilerParams(dimension_semantics=("parallel",)),
    )(ids, param_slab)

    return out[:B, :OUTPUT_DIM]


def init_params(key):
    """Parameters in the original PyTorch nn.Module layout (weight = (out, in))."""
    k_emb, k_w1, k_b1, k_w2, k_b2 = jax.random.split(key, 5)
    in_features = CONTEXT_SIZE * EMBEDDING_DIM

    emb = jax.random.normal(k_emb, (VOCAB_SIZE, EMBEDDING_DIM), dtype=jnp.float32)
    emb = emb.at[0].set(0.0)  # padding_idx=0 row is zero (forward-only)

    w1 = 0.05 * jax.random.normal(k_w1, (HIDDEN_DIM, in_features), dtype=jnp.float32)
    b1 = 0.05 * jax.random.normal(k_b1, (HIDDEN_DIM,), dtype=jnp.float32)
    w2 = 0.05 * jax.random.normal(k_w2, (OUTPUT_DIM, HIDDEN_DIM), dtype=jnp.float32)
    b2 = 0.05 * jax.random.normal(k_b2, (OUTPUT_DIM,), dtype=jnp.float32)

    return {"embedding": emb, "fc1_w": w1, "fc1_b": b1, "fc2_w": w2, "fc2_b": b2}


if __name__ == "__main__":
    key = jax.random.PRNGKey(0)
    k_params, k_ids = jax.random.split(key)

    params = init_params(k_params)       # PyTorch layout
    param_slab = prepare_params(params)  # one-time fuse + pack (hoisted out of forward)

    context_words = jax.random.randint(
        k_ids, (BATCH, CONTEXT_SIZE), minval=0, maxval=VOCAB_SIZE, dtype=jnp.int32
    )

    out = simple_ffnn_forward(context_words, param_slab)
    out = jax.block_until_ready(out)

    # Pure-JAX reference of the original module semantics (f32, highest precision).
    emb_flat = jnp.take(params["embedding"], context_words, axis=0).reshape(BATCH, -1)
    h_ref = jnp.maximum(
        jnp.dot(emb_flat, params["fc1_w"].T, precision=jax.lax.Precision.HIGHEST)
        + params["fc1_b"], 0.0)
    ref = (jnp.dot(h_ref, params["fc2_w"].T, precision=jax.lax.Precision.HIGHEST)
           + params["fc2_b"])

    assert out.shape == (BATCH, OUTPUT_DIM)
    max_err = float(jnp.max(jnp.abs(out - ref)))
    # Slightly looser than 1e-5 to allow for the f32 reassociation introduced by the
    # offline (embedding @ fc1) fusion; still far below any real-bug scale.
    assert jnp.allclose(out, ref, atol=5e-5, rtol=5e-5), max_err

    print("KERNEL_OK")
</pallas_src>

<mosaic_0001>
module attributes {stable_mosaic.version = 11 : i64} {
  func.func @fused_ffnn_kernel(%arg0: i32, %arg1: memref<4x8xi32, #tpu.memory_space<vmem>>, %arg2: memref<296x128xf32, #tpu.memory_space<vmem>>, %arg3: memref<4x128xf32, #tpu.memory_space<vmem>>) attributes {dimension_semantics = [#tpu.dimension_semantics<parallel>], iteration_bounds = array<i64: 1>, scalar_prefetch = 0 : i64, scratch_operands = 0 : i64, tpu.core_type = #tpu.core_type<tc>, window_params = [{transform_indices = @transform_0, window_bounds = array<i64: 4, 8>}, {pipeline_mode = #tpu.pipeline_mode<synchronous>, transform_indices = @transform_1, window_bounds = array<i64: 296, 128>}, {transform_indices = @transform_2, window_bounds = array<i64: 4, 128>}]} {
    %c0 = arith.constant 0 : index
    %c0_0 = arith.constant 0 : index
    %0 = vector.load %arg1[%c0, %c0_0] : memref<4x8xi32, #tpu.memory_space<vmem>>, vector<4x8xi32>
    %1 = tpu.iota {dimensions = array<i32: 1>} : vector<4x256xi32>
    %2 = vector.extract_strided_slice %0 {offsets = [0, 0], sizes = [4, 1], strides = [1, 1]} : vector<4x8xi32> to vector<4x1xi32>
    %3 = vector.broadcast %2 : vector<4x1xi32> to vector<4x256xi32>
    %4 = arith.cmpi eq, %1, %3 : vector<4x256xi32>
    %5 = vector.extract_strided_slice %0 {offsets = [0, 1], sizes = [4, 1], strides = [1, 1]} : vector<4x8xi32> to vector<4x1xi32>
    %c32_i32 = arith.constant 32 : i32
    %6 = vector.broadcast %c32_i32 : i32 to vector<4x1xi32>
    %7 = arith.addi %5, %6 : vector<4x1xi32>
    %8 = vector.broadcast %7 : vector<4x1xi32> to vector<4x256xi32>
    %9 = arith.cmpi eq, %1, %8 : vector<4x256xi32>
    %10 = arith.ori %4, %9 : vector<4x256xi1>
    %11 = vector.extract_strided_slice %0 {offsets = [0, 2], sizes = [4, 1], strides = [1, 1]} : vector<4x8xi32> to vector<4x1xi32>
    %c64_i32 = arith.constant 64 : i32
    %12 = vector.broadcast %c64_i32 : i32 to vector<4x1xi32>
    %13 = arith.addi %11, %12 : vector<4x1xi32>
    %14 = vector.broadcast %13 : vector<4x1xi32> to vector<4x256xi32>
    %15 = arith.cmpi eq, %1, %14 : vector<4x256xi32>
    %16 = arith.ori %10, %15 : vector<4x256xi1>
    %17 = vector.extract_strided_slice %0 {offsets = [0, 3], sizes = [4, 1], strides = [1, 1]} : vector<4x8xi32> to vector<4x1xi32>
    %c96_i32 = arith.constant 96 : i32
    %18 = vector.broadcast %c96_i32 : i32 to vector<4x1xi32>
    %19 = arith.addi %17, %18 : vector<4x1xi32>
    %20 = vector.broadcast %19 : vector<4x1xi32> to vector<4x256xi32>
    %21 = arith.cmpi eq, %1, %20 : vector<4x256xi32>
    %22 = arith.ori %16, %21 : vector<4x256xi1>
    %23 = vector.extract_strided_slice %0 {offsets = [0, 4], sizes = [4, 1], strides = [1, 1]} : vector<4x8xi32> to vector<4x1xi32>
    %c128_i32 = arith.constant 128 : i32
    %24 = vector.broadcast %c128_i32 : i32 to vector<4x1xi32>
    %25 = arith.addi %23, %24 : vector<4x1xi32>
    %26 = vector.broadcast %25 : vector<4x1xi32> to vector<4x256xi32>
    %27 = arith.cmpi eq, %1, %26 : vector<4x256xi32>
    %28 = arith.ori %22, %27 : vector<4x256xi1>
    %29 = vector.extract_strided_slice %0 {offsets = [0, 5], sizes = [4, 1], strides = [1, 1]} : vector<4x8xi32> to vector<4x1xi32>
    %c160_i32 = arith.constant 160 : i32
    %30 = vector.broadcast %c160_i32 : i32 to vector<4x1xi32>
    %31 = arith.addi %29, %30 : vector<4x1xi32>
    %32 = vector.broadcast %31 : vector<4x1xi32> to vector<4x256xi32>
    %33 = arith.cmpi eq, %1, %32 : vector<4x256xi32>
    %34 = arith.ori %28, %33 : vector<4x256xi1>
    %35 = vector.extract_strided_slice %0 {offsets = [0, 6], sizes = [4, 1], strides = [1, 1]} : vector<4x8xi32> to vector<4x1xi32>
    %c192_i32 = arith.constant 192 : i32
    %36 = vector.broadcast %c192_i32 : i32 to vector<4x1xi32>
    %37 = arith.addi %35, %36 : vector<4x1xi32>
    %38 = vector.broadcast %37 : vector<4x1xi32> to vector<4x256xi32>
    %39 = arith.cmpi eq, %1, %38 : vector<4x256xi32>
    %40 = arith.ori %34, %39 : vector<4x256xi1>
    %41 = vector.extract_strided_slice %0 {offsets = [0, 7], sizes = [4, 1], strides = [1, 1]} : vector<4x8xi32> to vector<4x1xi32>
    %c224_i32 = arith.constant 224 : i32
    %42 = vector.broadcast %c224_i32 : i32 to vector<4x1xi32>
    %43 = arith.addi %41, %42 : vector<4x1xi32>
    %44 = vector.broadcast %43 : vector<4x1xi32> to vector<4x256xi32>
    %45 = arith.cmpi eq, %1, %44 : vector<4x256xi32>
    %46 = arith.ori %40, %45 : vector<4x256xi1>
    %47 = arith.extui %46 : vector<4x256xi1> to vector<4x256xi32>
    %48 = arith.sitofp %47 : vector<4x256xi32> to vector<4x256xf32>
    %c0_1 = arith.constant 0 : index
    %c0_2 = arith.constant 0 : index
    %49 = vector.load %arg2[%c0_1, %c0_2] : memref<296x128xf32, #tpu.memory_space<vmem>>, vector<256x32xf32>
    %c288 = arith.constant 288 : index
    %c0_3 = arith.constant 0 : index
    %50 = vector.load %arg2[%c288, %c0_3] : memref<296x128xf32, #tpu.memory_space<vmem>>, vector<1x32xf32>
    %c256 = arith.constant 256 : index
    %c0_4 = arith.constant 0 : index
    %51 = vector.load %arg2[%c256, %c0_4] : memref<296x128xf32, #tpu.memory_space<vmem>>, vector<32x128xf32>
    %c289 = arith.constant 289 : index
    %c0_5 = arith.constant 0 : index
    %52 = vector.load %arg2[%c289, %c0_5] : memref<296x128xf32, #tpu.memory_space<vmem>>, vector<1x128xf32>
    %cst = arith.constant dense<0.000000e+00> : vector<4x32xf32>
    %53 = tpu.matmul %48, %49, %cst {dimension_numbers = #tpu.dot_dimension_numbers<[1], [0], [0], [1], [0, 0, 1, 1], [], []>} : vector<4x256xf32>, vector<256x32xf32>, vector<4x32xf32> -> vector<4x32xf32>
    %54 = vector.broadcast %50 : vector<1x32xf32> to vector<4x32xf32>
    %55 = arith.addf %53, %54 : vector<4x32xf32>
    %cst_6 = arith.constant 0.000000e+00 : f32
    %56 = vector.broadcast %cst_6 : f32 to vector<4x32xf32>
    %57 = arith.maximumf %55, %56 : vector<4x32xf32>
    %cst_7 = arith.constant dense<0.000000e+00> : vector<4x128xf32>
    %58 = tpu.matmul %57, %51, %cst_7 {dimension_numbers = #tpu.dot_dimension_numbers<[1], [0], [0], [1], [0, 0, 1, 1], [], []>} : vector<4x32xf32>, vector<32x128xf32>, vector<4x128xf32> -> vector<4x128xf32>
    %59 = vector.broadcast %52 : vector<1x128xf32> to vector<4x128xf32>
    %60 = arith.addf %58, %59 : vector<4x128xf32>
    %c0_8 = arith.constant 0 : index
    %c0_9 = arith.constant 0 : index
    %61 = vector.load %arg3[%c0_8, %c0_9] : memref<4x128xf32, #tpu.memory_space<vmem>>, vector<4x128xf32>
    tpu.vector_store %arg3[%c0_8, %c0_9], %60 {strides = array<i32>} : memref<4x128xf32, #tpu.memory_space<vmem>>, vector<4x128xf32>,
    return
  }
  func.func @transform_0(%arg0: i32) -> (i32, i32) {
    %c0_i32 = arith.constant 0 : i32
    %c0_i32_0 = arith.constant 0 : i32
    return %arg0, %c0_i32 : i32, i32
  }
  func.func @transform_1(%arg0: i32) -> (i32, i32) {
    %c0_i32 = arith.constant 0 : i32
    %c0_i32_0 = arith.constant 0 : i32
    %c0_i32_1 = arith.constant 0 : i32
    return %c0_i32, %c0_i32_0 : i32, i32
  }
  func.func @transform_2(%arg0: i32) -> (i32, i32) {
    %c0_i32 = arith.constant 0 : i32
    %c0_i32_0 = arith.constant 0 : i32
    return %arg0, %c0_i32 : i32, i32
  }
}

</mosaic_0001>

<bundles_post_ra>
// kernel: simple_ffnn_forward.1
= control target key start
LH: loop header
LB: loop body
LE: loop exit
PB: predicated region body
PF: predicated region fallthrough
CT: control target
= control target key end

     0   :  { %7 = vsyncpa [#allocation3], 0  ;;  %s590_s0 = inlined_call_operand.hbm [shape: s32[4,8], index: 0, kind: input, shape index: {}]   ;;  %s591_s1 = inlined_call_operand.hbm [shape: f32[296,128], index: 1, kind: input, shape index: {}]   ;;  %s592_s2 = inlined_call_operand.hbm [shape: f32[4,128], index: 2, kind: output, shape index: {}]  }
   0x1   :  { %8 = vsyncpa [#allocation6], 0 }
   0x2   :  { %9 = vsyncpa [#allocation4], 0  ;;  %s506_s9 = smov [#allocation2]   ;;  %s507_s11 = smov [#allocation5]  }
   0x3   :  { %s16_s10 = sshll.u32 %s506_s9, 4  ;;  %s25_s12 = sshll.u32 %s507_s11, 4  ;;  %s17_s10 = int_to_ptr.vmem [resolvable:$true] %s16_s10  ;;  %s537_s12 = int_to_ptr.vmem [resolvable:$true] %s25_s12 }
   0x4   :  { %s434_s15 = scalar_lea.hbm %s590_s0, 64 }
   0x5   :  { %p435_p0 = scmp.ne.s32.totalorder %s590_s0, %s434_s15  ;;  %p438_p1 = scmp.lt.u32.totalorder %s434_s15, %s590_s0 }
   0x7   :  { %p440_p2 = pnand %p438_p1, %p435_p0 }
   0x9   :  { %443 = shalt.err (!%p440_p2)
}
   0xa   :  { %s444_s20 = scalar_lea.vmem %s17_s10, 64  ;;  %p449_p4 = scmp.lt.s32.totalorder %s17_s10, %s17_s10 }
   0xb   :  { %p445_p3 = scmp.ne.s32.totalorder %s17_s10, %s444_s20  ;;  %p450_p5 = scmp.lt.s32.totalorder %s444_s20, %s444_s20 }
   0xd   :  { %p451_p6 = por %p450_p5, %p449_p4 }
   0xf   :  { %p452_p7 = pnand %p451_p6, %p445_p3 }
  0x11   :  { %455 = shalt.err (!%p452_p7)
}
  0x12   :  { %19 = dma.hbm_to_vmem [thread:$0]  %s590_s0, 64, %s17_s10, [#allocation3]  }
  0x13   :  { %s456_s25 = scalar_lea.hbm %s591_s1, 4736 }
  0x14   :  { %p457_p8 = scmp.ne.s32.totalorder %s591_s1, %s456_s25  ;;  %p460_p9 = scmp.lt.u32.totalorder %s456_s25, %s591_s1 }
  0x16   :  { %p462_p10 = pnand %p460_p9, %p457_p8 }
  0x18   :  { %465 = shalt.err (!%p462_p10)
}
  0x19   :  { %s466_s30 = scalar_lea.vmem %s537_s12, 4736  ;;  %p471_p12 = scmp.lt.s32.totalorder %s537_s12, %s537_s12 }
  0x1a   :  { %p467_p11 = scmp.ne.s32.totalorder %s537_s12, %s466_s30  ;;  %p472_p13 = scmp.lt.s32.totalorder %s466_s30, %s466_s30 }
  0x1c   :  { %p473_p0 = por %p472_p13, %p471_p12 }
  0x1e   :  { %p474_p1 = pnand %p473_p0, %p467_p11 }
  0x20   :  { %477 = shalt.err (!%p474_p1)
}
  0x21   :  { %s508_s0 = smov 128   ;;  %s509_s3 = smov 8  }
  0x22   :  { %31 = dma.hbm_to_vmem [thread:$0]  %s591_s1, 4736, %s537_s12, [#allocation6], %s508_s0, %s508_s0, %s509_s3  }
  0x23   :  { %500 = dma.done.wait [#allocation3], 64  }
  0x24   :  { %501 = vsyncadd [#allocation3], 4294967232 }
  0x25   :  { %502 = dma.done.wait [#allocation6], 4736  }
  0x26   :  { %503 = vsyncadd [#allocation6], 4294962560  ;;  %v510_v0 = vmov 0   ;;  %v511_v1 = vmov 2   ;;  %v568_v2 = vld [vmem:[#allocation2] sm:$0xf] }
  0x27   :  { %425 = vset.pattern.permute.xlu0 %v510_v0  ;;  %427 = vset.pattern.permute.xlu1 %v511_v1  ;;  %v123_v3 = vld [vmem:[#allocation5 + $0x80] sm:$0xff]  ;;  %v124_v4 = vld [vmem:[#allocation5 + $0x88] sm:$0xff]  ;;  %v55_v5 = vadd.s32 64, %v568_v2  ;;  %v47_v8 = vadd.s32 32, %v568_v2  ;;  %v125_v10 = vld [vmem:[#allocation5 + $0x90] sm:$0xff]  ;;  %v63_v18 = vadd.s32 96, %v568_v2  ;;  %v39_v0 = vlaneseq }
  0x28   :  { %43 = vperm.xlu0 %425, %v568_v2   ;;  %v107_v6 = vld [vmem:[#allocation5] sm:$0xff]  ;;  %v108_v7 = vld [vmem:[#allocation5 + $0x8] sm:$0xff]  ;;  %v371_v9 = vpack.c.bf16 %v124_v4, %v123_v3  ;;  %v126_v11 = vld [vmem:[#allocation5 + $0x98] sm:$0xff]  ;;  %v512_v19 = vmov 1   ;;  %v513_v24 = vmov 3   ;;  %v79_v25 = vadd.s32 160, %v568_v2 }
  0x29   :  { %v109_v12 = vld [vmem:[#allocation5 + $0x10] sm:$0xff]  ;;  %57 = vperm.xlu1 %427, %v55_v5   ;;  %v373_v13 = vpack.c.bf16 %v108_v7, %v107_v6  ;;  %v375_v14 = vpack.c.bf16 %v126_v11, %v125_v10  ;;  %v110_v15 = vld [vmem:[#allocation5 + $0x18] sm:$0xff]  ;;  %v127_v16 = vld [vmem:[#allocation5 + $0xa0] sm:$0xff]  ;;  %v71_v28 = vadd.s32 128, %v568_v2  ;;  %v514_v30 = vmov 5   ;;  %s521_s1 = smov [#allocation7]  }
  0x2a   :  { %v128_v17 = vld [vmem:[#allocation5 + $0xa8] sm:$0xff]  ;;  %372 = vmatprep.subr.bf16.mxu0 %v371_v9  ;;  %v377_v20 = vpack.c.bf16 %v110_v15, %v109_v12  ;;  %v111_v22 = vld [vmem:[#allocation5 + $0x20] sm:$0xff]  ;;  %v129_v26 = vld [vmem:[#allocation5 + $0xb0] sm:$0xff]  ;;  %v515_v36 = vmov 4   ;;  %v87_v38 = vadd.s32 192, %v568_v2  ;;  %v516_v44 = vmov 7  }
  0x2b   :  { %374 = vmatpush3.bf16.msra.mxu0 %v373_v13  ;;  %v379_v21 = vpack.c.bf16 %v128_v17, %v127_v16  ;;  %v112_v23 = vld [vmem:[#allocation5 + $0x28] sm:$0xff]  ;;  %v130_v27 = vld [vmem:[#allocation5 + $0xb8] sm:$0xff]  ;;  %v113_v32 = vld [vmem:[#allocation5 + $0x30] sm:$0xff]  ;;  %v517_v45 = vmov 6   ;;  %v95_v50 = vadd.s32 224, %v568_v2  ;;  %v40_v2 = vand.u32 127, %v39_v0 }
  0x2c   :  { %426 = vset.pattern.permute.xlu0 %v512_v19  ;;  %376 = vmatprep.subr.bf16.mxu0 %v375_v14  ;;  %v381_v29 = vpack.c.bf16 %v112_v23, %v111_v22  ;;  %v383_v31 = vpack.c.bf16 %v130_v27, %v129_v26  ;;  %v114_v33 = vld [vmem:[#allocation5 + $0x38] sm:$0xff]  ;;  %v131_v34 = vld [vmem:[#allocation5 + $0xc0] sm:$0xff]  ;;  %v132_v35 = vld [vmem:[#allocation5 + $0xc8] sm:$0xff]  ;;  %v518_v11 = vmov 0.0   ;;  %v519_v16 = vmov 0.0|0.0   ;;  %s305_s6 = sshll.u32 %s521_s1, 4  ;;  %s306_s6 = int_to_ptr.vmem [resolvable:$true] %s305_s6 }
  0x2d   :  { %49 = vperm.xlu0 %426, %v47_v8   ;;  %428 = vset.pattern.permute.xlu1 %v513_v24  ;;  %v385_v37 = vpack.c.bf16 %v114_v33, %v113_v32  ;;  %v387_v39 = vpack.c.bf16 %v132_v35, %v131_v34  ;;  %v115_v40 = vld [vmem:[#allocation5 + $0x40] sm:$0xff]  ;;  %v116_v41 = vld [vmem:[#allocation5 + $0x48] sm:$0xff]  ;;  %v133_v42 = vld [vmem:[#allocation5 + $0xd0] sm:$0xff]  ;;  %v41_v4 = vadd.s32 128, %v40_v2  ;;  %s478_s7 = scalar_lea.vmem %s306_s6, 64  ;;  %p483_p3 = scmp.lt.s32.totalorder %s306_s6, %s306_s6 }
  0x2e   :  { %65 = vperm.xlu1 %428, %v63_v18   ;;  %v134_v43 = vld [vmem:[#allocation5 + $0xd8] sm:$0xff]  ;;  %v389_v46 = vpack.c.bf16 %v116_v41, %v115_v40  ;;  %v117_v48 = vld [vmem:[#allocation5 + $0x50] sm:$0xff]  ;;  %v135_v51 = vld [vmem:[#allocation5 + $0xe0] sm:$0xff]  ;;  %403 = vmatprep.subr.bf16.mxu1 %v519_v16  ;;  %p479_p2 = scmp.ne.s32.totalorder %s306_s6, %s478_s7  ;;  %p484_p4 = scmp.lt.s32.totalorder %s478_s7, %s478_s7 }
  0x2f   :  { %378 = vmatpush3.bf16.msra.mxu0 %v377_v20  ;;  %v391_v47 = vpack.c.bf16 %v134_v43, %v133_v42  ;;  %v118_v49 = vld [vmem:[#allocation5 + $0x58] sm:$0xff]  ;;  %v136_v52 = vld [vmem:[#allocation5 + $0xe8] sm:$0xff]  ;;  %v119_v55 = vld [vmem:[#allocation5 + $0x60] sm:$0xff] }
  0x30   :  { %380 = vmatprep.subr.bf16.mxu0 %v379_v21  ;;  %v393_v53 = vpack.c.bf16 %v118_v49, %v117_v48  ;;  %v395_v54 = vpack.c.bf16 %v136_v52, %v135_v51  ;;  %v120_v56 = vld [vmem:[#allocation5 + $0x68] sm:$0xff]  ;;  %v137_v57 = vld [vmem:[#allocation5 + $0xf0] sm:$0xff]  ;;  %v138_v58 = vld [vmem:[#allocation5 + $0xf8] sm:$0xff]  ;;  %p485_p5 = por %p484_p4, %p483_p3 }
  0x31   :  { %430 = vset.pattern.permute.xlu0 %v514_v30  ;;  %v397_v59 = vpack.c.bf16 %v120_v56, %v119_v55  ;;  %v399_v60 = vpack.c.bf16 %v138_v58, %v137_v57  ;;  %v121_v61 = vld [vmem:[#allocation5 + $0x70] sm:$0xff]  ;;  %v122_v62 = vld [vmem:[#allocation5 + $0x78] sm:$0xff]  ;;  %v140_v14 = vld [vmem:[#allocation5 + $0x100] sm:$0xff] }
  0x32   :  { %81 = vperm.xlu0 %430, %v79_v25   ;;  %429 = vset.pattern.permute.xlu1 %v515_v36  ;;  %v401_v63 = vpack.c.bf16 %v122_v62, %v121_v61  ;;  %v141_v15 = vld [vmem:[#allocation5 + $0x108] sm:$0xff]  ;;  %v142_v18 = vld [vmem:[#allocation5 + $0x110] sm:$0xff]  ;;  %v143_v19 = vld [vmem:[#allocation5 + $0x118] sm:$0xff]  ;;  %p486_p6 = pnand %p485_p5, %p479_p2 }
  0x33   :  { %73 = vperm.xlu1 %429, %v71_v28   ;;  %382 = vmatpush3.bf16.msra.mxu0 %v381_v29  ;;  %v404_v17 = vpack.c.bf16 %v141_v15, %v140_v14  ;;  %v407_v20 = vpack.c.bf16 %v143_v19, %v142_v18  ;;  %v317_v22 = vld [vmem:[#allocation5 + $0x120] ss:$0 sm:$0xff]  ;;  %v318_v27 = vld [vmem:[#allocation5 + $0x121] ss:$0 sm:$0xff] }
  0x34   :  { %384 = vmatprep.subr.bf16.mxu0 %v383_v31 }
  0x35   :  { %405 = vmatpush3.bf16.msra.mxu1 %v404_v17 }
  0x36   :  { %433 = vset.pattern.permute.xlu0 %v516_v44  ;;  %406 = vmatprep.subr.bf16.mxu1 %v519_v16 }
  0x37   :  { %431 = vset.pattern.permute.xlu1 %v517_v45  ;;  %386 = vmatpush3.bf16.msra.mxu0 %v385_v37 }
  0x38   :  { %89 = vperm.xlu1 %431, %v87_v38   ;;  %388 = vmatprep.subr.bf16.mxu0 %v387_v39 }
  0x39   :  { %408 = vmatpush3.bf16.msra.mxu1 %v407_v20 }
  0x3b   :  { %390 = vmatpush3.bf16.msra.mxu0 %v389_v46 }
  0x3c   :  { %432 = vset.pattern.permute.xlu1 %v516_v44  ;;  %392 = vmatprep.subr.bf16.mxu0 %v391_v47 }
  0x3d   :  { %97 = vperm.xlu1 %432, %v95_v50  }
  0x3f   :  { %394 = vmatpush3.bf16.msra.mxu0 %v393_v53 }
  0x40   :  { %396 = vmatprep.subr.bf16.mxu0 %v395_v54 }
  0x43   :  { %398 = vmatpush3.bf16.msra.mxu0 %v397_v59 }
  0x44   :  { %400 = vmatprep.subr.bf16.mxu0 %v399_v60 }
  0x47   :  { %402 = vmatpush3.bf16.msra.mxu0 %v401_v63 }
  0xa7   :  { %v44_v1 = vpop.permute.xlu0 %43 }
  0xa8   :  { %v58_v3 = vpop.permute.xlu1 %57  ;;  %vm45_vm0 = vcmp.eq.s32.totalorder %v40_v2, %v44_v1  ;;  %vm46_vm2 = vcmp.eq.s32.totalorder %v41_v4, %v44_v1 }
  0xa9   :  { %vm59_vm6 = vcmp.eq.s32.totalorder %v40_v2, %v58_v3  ;;  %vm60_vm7 = vcmp.eq.s32.totalorder %v41_v4, %v58_v3 }
  0xac   :  { %v50_v5 = vpop.permute.xlu0 %49 }
  0xad   :  { %vm51_vm1 = vcmp.eq.s32.totalorder %v40_v2, %v50_v5  ;;  %vm52_vm3 = vcmp.eq.s32.totalorder %v41_v4, %v50_v5  ;;  %v66_v6 = vpop.permute.xlu1 %65 }
  0xae   :  { %vm53_vm4 = vmor %vm45_vm0, %vm51_vm1  ;;  %vm67_vm9 = vcmp.eq.s32.totalorder %v40_v2, %v66_v6  ;;  %vm68_vm11 = vcmp.eq.s32.totalorder %v41_v4, %v66_v6 }
  0xaf   :  { %vm54_vm5 = vmor %vm46_vm2, %vm52_vm3 }
  0xb0   :  { %vm61_vm8 = vmor %vm53_vm4, %vm59_vm6 }
  0xb1   :  { %vm62_vm10 = vmor %vm54_vm5, %vm60_vm7  ;;  %v82_v8 = vpop.permute.xlu0 %81 }
  0xb2   :  { %v74_v7 = vpop.permute.xlu1 %73  ;;  %vm69_vm13 = vmor %vm61_vm8, %vm67_vm9  ;;  %vm83_vm1 = vcmp.eq.s32.totalorder %v40_v2, %v82_v8  ;;  %vm84_vm3 = vcmp.eq.s32.totalorder %v41_v4, %v82_v8 }
  0xb3   :  { %vm75_vm12 = vcmp.eq.s32.totalorder %v40_v2, %v74_v7  ;;  %vm76_vm14 = vcmp.eq.s32.totalorder %v41_v4, %v74_v7  ;;  %vm70_vm15 = vmor %vm62_vm10, %vm68_vm11 }
  0xb4   :  { %vm77_vm0 = vmor %vm69_vm13, %vm75_vm12 }
  0xb5   :  { %vm78_vm2 = vmor %vm70_vm15, %vm76_vm14  ;;  %vm520_vm14 = vmmov 0   ;;  %vm224_vm15 = vcmask 261120  }
  0xb6   :  { %vm85_vm6 = vmor %vm77_vm0, %vm83_vm1  ;;  %368 = vmatprep.mubr.msk.f32.mxu1 %vm520_vm14, %v518_v11 }
  0xb7   :  { %v90_v9 = vpop.permute.xlu1 %89  ;;  %vm86_vm7 = vmor %vm78_vm2, %vm84_vm3 }
  0xb8   :  { %vm91_vm4 = vcmp.eq.s32.totalorder %v40_v2, %v90_v9  ;;  %vm92_vm5 = vcmp.eq.s32.totalorder %v41_v4, %v90_v9 }
  0xb9   :  { %vm93_vm8 = vmor %vm85_vm6, %vm91_vm4 }
  0xba   :  { %vm94_vm11 = vmor %vm86_vm7, %vm92_vm5 }
  0xbc   :  { %v98_v10 = vpop.permute.xlu1 %97 }
  0xbd   :  { %vm99_vm9 = vcmp.eq.s32.totalorder %v40_v2, %v98_v10  ;;  %vm100_vm10 = vcmp.eq.s32.totalorder %v41_v4, %v98_v10 }
  0xbe   :  { %vm101_vm12 = vmor %vm93_vm8, %vm99_vm9 }
  0xbf   :  { %vm102_vm13 = vmor %vm94_vm11, %vm100_vm10  ;;  %v315_v12 = vsel %vm101_vm12, 1.0, %v518_v11 }
  0xc0   :  { %v316_v13 = vsel %vm102_vm13, 1.0, %v518_v11 }
  0xc1   :  { %213 = vmatprep.mubr.f32.mxu0 %v316_v13 }
  0xc2   :  { %214 = vmatmul.mubr.f32.vlgmr.msra.gmra.mrb[0].mxu0 %v315_v12 }
 0x195   :  { %v352_v21 = vpop.f32.mrb[0].mxu0 }
 0x196   :  { %v353_v23 = vpop.f32.mrb[1].mxu0 }
 0x197   :  { %v354_v24 = vadd.f32 %v353_v23, %v352_v21 }
 0x199   :  { %v216_v25 = vadd.f32 %v354_v24, %v317_v22 }
 0x19b   :  { %v219_v26 = vmax.f32 %v216_v25, 0.0 }
 0x19d   :  { %369 = vmatmul.mubr.msk.f32.vlgmr.msra.gmra.mrb[0].mxu1 %vm224_vm15, %v219_v26 }
 0x270   :  { %v294_v28 = vpop.f32.mrb[0].mxu1 }
 0x271   :  { %v295_v29 = vadd.f32 %v318_v27, %v294_v28  ;;  %v370_v30 = vpop.f32.mrb[1].mxu1 }
 0x273   :  { %298 = vst [vmem:[#allocation7] sm:$0xf] %v295_v29 }
 0x274   :  { %489 = shalt.err (!%p486_p6)
}
 0x275   :  { %s490_s10 = scalar_lea.hbm %s592_s2, 64 }
 0x276   :  { %p491_p7 = scmp.ne.s32.totalorder %s592_s2, %s490_s10  ;;  %p494_p8 = scmp.lt.u32.totalorder %s490_s10, %s592_s2 }
 0x278   :  { %p496_p9 = pnand %p494_p8, %p491_p7 }
 0x27a   :  { %499 = shalt.err (!%p496_p9)
}
 0x27b   :  { %308 = dma.vmem_to_hbm [thread:$0]  %s306_s6, 64, %s592_s2, [#allocation4]  }
 0x27c   :  { %504 = dma.done.wait [#allocation4], 64  }
 0x27d   :  { %505 = vsyncadd [#allocation4], 4294967232 }
 0x27e   :  { %312 = vsyncpa [#allocation3], 1 }
 0x27f   :  { %313 = vsyncpa [#allocation6], 1 }
 0x280   :  { %314 = vsyncpa [#allocation4], 1 }

</bundles_post_ra>
